<compile_context>
chip_gen: v7x
topology: tpu7x:2x2x1
jax: 0.10.0
libtpu: 0.0.40
codegen_flags: <defaults>
</compile_context>

<pallas_src>
import functools

import jax
import jax.numpy as jnp
from jax.experimental import pallas as pl
from jax.experimental.pallas import tpu as pltpu


# Row offsets of each parameter inside the packed (120, 128) blob.
# All starts are multiples of 8 (sublane-aligned).
_W1_ROW, _W2_ROW, _W3_ROW, _W4_ROW = 0, 40, 64, 80
_B1_ROW, _B2_ROW, _B3_ROW, _B4_ROW = 88, 96, 104, 112
_BLOB_ROWS, _BLOB_COLS = 120, 128


def neuro_net_kernel(x_ref, p_ref, o_ref, *, matmul_dtype=jnp.float32):
    x = x_ref[...]

    # Static, sublane-aligned views into the packed parameter blob.
    w1 = p_ref[_W1_ROW:_W1_ROW + 40, 0:20]
    w2 = p_ref[_W2_ROW:_W2_ROW + 20, 0:10]
    w3 = p_ref[_W3_ROW:_W3_ROW + 10, 0:5]
    w4 = p_ref[_W4_ROW:_W4_ROW + 5, 0:2]
    b1 = p_ref[_B1_ROW:_B1_ROW + 1, 0:20]
    b2 = p_ref[_B2_ROW:_B2_ROW + 1, 0:10]
    b3 = p_ref[_B3_ROW:_B3_ROW + 1, 0:5]
    b4 = p_ref[_B4_ROW:_B4_ROW + 1, 0:2]

    def dense(h, w, b, relu):
        y = jnp.dot(h.astype(matmul_dtype), w.astype(matmul_dtype),
                    preferred_element_type=jnp.float32) + b
        return jnp.maximum(y, 0.0) if relu else y

    h = dense(x, w1, b1, relu=True)
    h = dense(h, w2, b2, relu=True)
    h = dense(h, w3, b3, relu=True)
    logits = dense(h, w4, b4, relu=False)

    # torch.nn.Softmax(dim=0): softmax across the batch dimension, per column.
    m = jnp.max(logits, axis=0, keepdims=True)
    e = jnp.exp(logits - m)
    s = jnp.sum(e, axis=0, keepdims=True)
    o_ref[...] = e * pl.reciprocal(s, approx=False)


def pack_params(params):
    """Pack all weights/biases into one pre-padded (120, 128) f32 blob.

    Done once per parameter set (amortized across forward calls)."""
    blob = jnp.zeros((_BLOB_ROWS, _BLOB_COLS), jnp.float32)
    blob = blob.at[_W1_ROW:_W1_ROW + 40, 0:20].set(params["w1"])
    blob = blob.at[_W2_ROW:_W2_ROW + 20, 0:10].set(params["w2"])
    blob = blob.at[_W3_ROW:_W3_ROW + 10, 0:5].set(params["w3"])
    blob = blob.at[_W4_ROW:_W4_ROW + 5, 0:2].set(params["w4"])
    blob = blob.at[_B1_ROW, 0:20].set(params["b1"].reshape(20))
    blob = blob.at[_B2_ROW, 0:10].set(params["b2"].reshape(10))
    blob = blob.at[_B3_ROW, 0:5].set(params["b3"].reshape(5))
    blob = blob.at[_B4_ROW, 0:2].set(params["b4"].reshape(2))
    return blob


def neuro_net_forward(x, params_blob, *, matmul_dtype=jnp.float32):
    """x: (B, 40) f32, params_blob: (120, 128) f32 from pack_params.
    Returns (B, 2) f32 softmax-over-batch probabilities."""
    B = x.shape[0]
    vmem = pl.BlockSpec(memory_space=pltpu.MemorySpace.VMEM)
    kernel = functools.partial(neuro_net_kernel, matmul_dtype=matmul_dtype)
    return pl.pallas_call(
        kernel,
        out_shape=jax.ShapeDtypeStruct((B, 2), jnp.float32),
        in_specs=[vmem, vmem],
        out_specs=vmem,
    )(x, params_blob)


def init_params(key):
    """Deterministic parameter init (uniform, PyTorch-Linear-style bounds)."""
    dims = [(40, 20), (20, 10), (10, 5), (5, 2)]
    params = {}
    for i, (fan_in, fan_out) in enumerate(dims, start=1):
        key, kw, kb = jax.random.split(key, 3)
        bound = 1.0 / jnp.sqrt(float(fan_in))
        params[f"w{i}"] = jax.random.uniform(
            kw, (fan_in, fan_out), jnp.float32, minval=-bound, maxval=bound)
        params[f"b{i}"] = jax.random.uniform(
            kb, (1, fan_out), jnp.float32, minval=-bound, maxval=bound)
    return params


def reference_forward(x, params):
    """Pure-JAX reference mirroring the PyTorch forward."""
    h = jnp.maximum(x @ params["w1"] + params["b1"], 0.0)
    h = jnp.maximum(h @ params["w2"] + params["b2"], 0.0)
    h = jnp.maximum(h @ params["w3"] + params["b3"], 0.0)
    logits = h @ params["w4"] + params["b4"]
    return jax.nn.softmax(logits, axis=0)


if __name__ == "__main__":
    key = jax.random.PRNGKey(0)
    key, kx = jax.random.split(key)

    B = 8  # small batch
    x = jax.random.normal(kx, (B, 40), dtype=jnp.float32)
    params = init_params(key)
    blob = jax.block_until_ready(pack_params(params))  # packed once, reused per call

    out = neuro_net_forward(x, blob)
    out = jax.block_until_ready(out)

    ref = reference_forward(x, params)
    assert out.shape == (B, 2)
    assert jnp.allclose(out, ref, atol=1e-5, rtol=1e-5), "mismatch vs reference"

    print("KERNEL_OK")
</pallas_src>

<mosaic_0001>
module attributes {stable_mosaic.version = 11 : i64} {
  func.func @neuro_net_kernel(%arg0: memref<8x40xf32, #tpu.memory_space<vmem>>, %arg1: memref<120x128xf32, #tpu.memory_space<vmem>>, %arg2: memref<8x2xf32, #tpu.memory_space<vmem>>) attributes {dimension_semantics = [], scalar_prefetch = 0 : i64, scratch_operands = 0 : i64, tpu.core_type = #tpu.core_type<tc>} {
    %c0 = arith.constant 0 : index
    %c0_0 = arith.constant 0 : index
    %0 = vector.load %arg0[%c0, %c0_0] : memref<8x40xf32, #tpu.memory_space<vmem>>, vector<8x40xf32>
    %c0_1 = arith.constant 0 : index
    %c0_2 = arith.constant 0 : index
    %1 = vector.load %arg1[%c0_1, %c0_2] : memref<120x128xf32, #tpu.memory_space<vmem>>, vector<40x20xf32>
    %c40 = arith.constant 40 : index
    %c0_3 = arith.constant 0 : index
    %2 = vector.load %arg1[%c40, %c0_3] : memref<120x128xf32, #tpu.memory_space<vmem>>, vector<20x10xf32>
    %c64 = arith.constant 64 : index
    %c0_4 = arith.constant 0 : index
    %3 = vector.load %arg1[%c64, %c0_4] : memref<120x128xf32, #tpu.memory_space<vmem>>, vector<10x5xf32>
    %c80 = arith.constant 80 : index
    %c0_5 = arith.constant 0 : index
    %4 = vector.load %arg1[%c80, %c0_5] : memref<120x128xf32, #tpu.memory_space<vmem>>, vector<5x2xf32>
    %c88 = arith.constant 88 : index
    %c0_6 = arith.constant 0 : index
    %5 = vector.load %arg1[%c88, %c0_6] : memref<120x128xf32, #tpu.memory_space<vmem>>, vector<1x20xf32>
    %c96 = arith.constant 96 : index
    %c0_7 = arith.constant 0 : index
    %6 = vector.load %arg1[%c96, %c0_7] : memref<120x128xf32, #tpu.memory_space<vmem>>, vector<1x10xf32>
    %c104 = arith.constant 104 : index
    %c0_8 = arith.constant 0 : index
    %7 = vector.load %arg1[%c104, %c0_8] : memref<120x128xf32, #tpu.memory_space<vmem>>, vector<1x5xf32>
    %c112 = arith.constant 112 : index
    %c0_9 = arith.constant 0 : index
    %8 = vector.load %arg1[%c112, %c0_9] : memref<120x128xf32, #tpu.memory_space<vmem>>, vector<1x2xf32>
    %cst = arith.constant dense<0.000000e+00> : vector<8x20xf32>
    %9 = tpu.matmul %0, %1, %cst {dimension_numbers = #tpu.dot_dimension_numbers<[1], [0], [0], [1], [0, 0, 1, 1], [], []>} : vector<8x40xf32>, vector<40x20xf32>, vector<8x20xf32> -> vector<8x20xf32>
    %10 = vector.broadcast %5 : vector<1x20xf32> to vector<8x20xf32>
    %11 = arith.addf %9, %10 : vector<8x20xf32>
    %cst_10 = arith.constant 0.000000e+00 : f32
    %12 = vector.broadcast %cst_10 : f32 to vector<8x20xf32>
    %13 = arith.maximumf %11, %12 : vector<8x20xf32>
    %cst_11 = arith.constant dense<0.000000e+00> : vector<8x10xf32>
    %14 = tpu.matmul %13, %2, %cst_11 {dimension_numbers = #tpu.dot_dimension_numbers<[1], [0], [0], [1], [0, 0, 1, 1], [], []>} : vector<8x20xf32>, vector<20x10xf32>, vector<8x10xf32> -> vector<8x10xf32>
    %15 = vector.broadcast %6 : vector<1x10xf32> to vector<8x10xf32>
    %16 = arith.addf %14, %15 : vector<8x10xf32>
    %cst_12 = arith.constant 0.000000e+00 : f32
    %17 = vector.broadcast %cst_12 : f32 to vector<8x10xf32>
    %18 = arith.maximumf %16, %17 : vector<8x10xf32>
    %cst_13 = arith.constant dense<0.000000e+00> : vector<8x5xf32>
    %19 = tpu.matmul %18, %3, %cst_13 {dimension_numbers = #tpu.dot_dimension_numbers<[1], [0], [0], [1], [0, 0, 1, 1], [], []>} : vector<8x10xf32>, vector<10x5xf32>, vector<8x5xf32> -> vector<8x5xf32>
    %20 = vector.broadcast %7 : vector<1x5xf32> to vector<8x5xf32>
    %21 = arith.addf %19, %20 : vector<8x5xf32>
    %cst_14 = arith.constant 0.000000e+00 : f32
    %22 = vector.broadcast %cst_14 : f32 to vector<8x5xf32>
    %23 = arith.maximumf %21, %22 : vector<8x5xf32>
    %cst_15 = arith.constant dense<0.000000e+00> : vector<8x2xf32>
    %24 = tpu.matmul %23, %4, %cst_15 {dimension_numbers = #tpu.dot_dimension_numbers<[1], [0], [0], [1], [0, 0, 1, 1], [], []>} : vector<8x5xf32>, vector<5x2xf32>, vector<8x2xf32> -> vector<8x2xf32>
    %25 = vector.broadcast %8 : vector<1x2xf32> to vector<8x2xf32>
    %26 = arith.addf %24, %25 : vector<8x2xf32>
    %cst_16 = arith.constant dense<0xFF800000> : vector<2xf32>
    %27 = vector.multi_reduction <maximumf>, %26, %cst_16 [0] : vector<8x2xf32> to vector<2xf32>
    %28 = vector.shape_cast %27 : vector<2xf32> to vector<1x2xf32>
    %29 = vector.broadcast %28 : vector<1x2xf32> to vector<8x2xf32>
    %30 = arith.subf %26, %29 : vector<8x2xf32>
    %31 = math.exp %30 : vector<8x2xf32>
    %cst_17 = arith.constant dense<0.000000e+00> : vector<2xf32>
    %32 = vector.multi_reduction <add>, %31, %cst_17 [0] : vector<8x2xf32> to vector<2xf32>
    %33 = vector.shape_cast %32 : vector<2xf32> to vector<1x2xf32>
    %34 = tpu.reciprocal %33 : vector<1x2xf32> -> vector<1x2xf32>
    %35 = vector.broadcast %34 : vector<1x2xf32> to vector<8x2xf32>
    %36 = arith.mulf %31, %35 : vector<8x2xf32>
    %c0_18 = arith.constant 0 : index
    %c0_19 = arith.constant 0 : index
    %37 = vector.load %arg2[%c0_18, %c0_19] : memref<8x2xf32, #tpu.memory_space<vmem>>, vector<8x2xf32>
    tpu.vector_store %arg2[%c0_18, %c0_19], %36 {strides = array<i32>} : memref<8x2xf32, #tpu.memory_space<vmem>>, vector<8x2xf32>,
    return
  }
}

</mosaic_0001>

<bundles_post_ra>
// kernel: tpu_custom_call.1
= control target key start
LH: loop header
LB: loop body
LE: loop exit
PB: predicated region body
PF: predicated region fallthrough
CT: control target
= control target key end

     0   :  { %7 = vsyncpa [#allocation3], 0  ;;  %s604_s0 = inlined_call_operand.hbm [shape: f32[8,40], index: 0, kind: input, shape index: {}]   ;;  %s605_s1 = inlined_call_operand.hbm [shape: f32[120,128], index: 1, kind: input, shape index: {}]   ;;  %s606_s2 = inlined_call_operand.vmem [shape: f32[8,2], index: 2, kind: output, shape index: {}]  }
   0x1   :  { %8 = vsyncpa [#allocation5], 0  ;;  %s540_s9 = smov [#allocation2]   ;;  %s541_s11 = smov [#allocation4]  }
   0x2   :  { %s15_s10 = sshll.u32 %s540_s9, 4  ;;  %s24_s12 = sshll.u32 %s541_s11, 4  ;;  %s16_s10 = int_to_ptr.vmem [resolvable:$true] %s15_s10  ;;  %s563_s12 = int_to_ptr.vmem [resolvable:$true] %s24_s12 }
   0x3   :  { %s492_s15 = scalar_lea.hbm %s604_s0, 128 }
   0x4   :  { %p493_p0 = scmp.ne.s32.totalorder %s604_s0, %s492_s15  ;;  %p496_p1 = scmp.lt.u32.totalorder %s492_s15, %s604_s0 }
   0x6   :  { %p498_p2 = pnand %p496_p1, %p493_p0 }
   0x8   :  { %501 = shalt.err (!%p498_p2)
}
   0x9   :  { %s502_s20 = scalar_lea.vmem %s16_s10, 128  ;;  %p507_p4 = scmp.lt.s32.totalorder %s16_s10, %s16_s10 }
   0xa   :  { %p503_p3 = scmp.ne.s32.totalorder %s16_s10, %s502_s20  ;;  %p508_p5 = scmp.lt.s32.totalorder %s502_s20, %s502_s20 }
   0xc   :  { %p509_p6 = por %p508_p5, %p507_p4 }
   0xe   :  { %p510_p7 = pnand %p509_p6, %p503_p3 }
  0x10   :  { %513 = shalt.err (!%p510_p7)
}
  0x11   :  { %18 = dma.hbm_to_vmem [thread:$0]  %s604_s0, 128, %s16_s10, [#allocation3]  }
  0x12   :  { %s514_s25 = scalar_lea.hbm %s605_s1, 1920 }
  0x13   :  { %p515_p8 = scmp.ne.s32.totalorder %s605_s1, %s514_s25  ;;  %p518_p9 = scmp.lt.u32.totalorder %s514_s25, %s605_s1 }
  0x15   :  { %p520_p10 = pnand %p518_p9, %p515_p8 }
  0x17   :  { %523 = shalt.err (!%p520_p10)
}
  0x18   :  { %s524_s30 = scalar_lea.vmem %s563_s12, 1920  ;;  %p529_p12 = scmp.lt.s32.totalorder %s563_s12, %s563_s12 }
  0x19   :  { %p525_p11 = scmp.ne.s32.totalorder %s563_s12, %s524_s30  ;;  %p530_p13 = scmp.lt.s32.totalorder %s524_s30, %s524_s30 }
  0x1b   :  { %p531_p0 = por %p530_p13, %p529_p12 }
  0x1d   :  { %p532_p1 = pnand %p531_p0, %p525_p11 }
  0x1f   :  { %535 = shalt.err (!%p532_p1)
}
  0x20   :  { %s542_s0 = smov 128   ;;  %s543_s3 = smov 8  }
  0x21   :  { %30 = dma.hbm_to_vmem [thread:$0]  %s605_s1, 1920, %s563_s12, [#allocation5], %s542_s0, %s542_s0, %s543_s3  }
  0x22   :  { %536 = dma.done.wait [#allocation3], 128  }
  0x23   :  { %537 = vsyncadd [#allocation3], 4294967168 }
  0x24   :  { %538 = dma.done.wait [#allocation5], 1920  }
  0x25   :  { %539 = vsyncadd [#allocation5], 4294965376  ;;  %v544_v0 = vmov 0.0|0.0   ;;  %vm545_vm0 = vmmov 0   ;;  %v546_v1 = vmov 0.0   ;;  %v38_v2 = vld [vmem:[#allocation4] sm:$0xff] }
  0x26   :  { %467 = vmatprep.subr.bf16.mxu0 %v544_v0  ;;  %443 = vmatprep.mubr.msk.f32.mxu0 %vm545_vm0, %v546_v1  ;;  %v39_v3 = vld [vmem:[#allocation4 + $0x8] sm:$0xff]  ;;  %v40_v4 = vld [vmem:[#allocation4 + $0x10] sm:$0xff]  ;;  %v41_v6 = vld [vmem:[#allocation4 + $0x18] sm:$0xff]  ;;  %vm57_vm1 = vcmask 326656   ;;  %vm140_vm2 = vcmask 1043456   ;;  %vm136_vm3 = vcmask 162816  }
  0x27   :  { %473 = vmatprep.subr.bf16.mxu1 %v544_v0  ;;  %452 = vmatprep.mubr.msk.f32.mxu1 %vm545_vm0, %v546_v1  ;;  %v468_v5 = vpack.c.bf16 %v39_v3, %v38_v2  ;;  %v471_v7 = vpack.c.bf16 %v41_v6, %v40_v4  ;;  %v42_v8 = vld [vmem:[#allocation4 + $0x20] sm:$0xff]  ;;  %v37_v9 = vld [vmem:[#allocation2] sm:$0xff]  ;;  %v43_v10 = vld [vmem:[#allocation4 + $0x28] sm:$0xff]  ;;  %vm223_vm4 = vcmask 1041408   ;;  %vm547_vm5 = vmmov 1  }
  0x28   :  { %v44_v11 = vld [vmem:[#allocation4 + $0x30] sm:$0xff]  ;;  %v45_v13 = vld [vmem:[#allocation4 + $0x38] sm:$0xf]  ;;  %v46_v19 = vld [vmem:[#allocation4 + $0x40] sm:$0xff]  ;;  %vm219_vm7 = vcmask 80896   ;;  %vm306_vm8 = vcmask 1044480  }
  0x29   :  { %469 = vmatpush3.bf16.msra.mxu0 %v468_v5  ;;  %v474_v12 = vpack.c.bf16 %v44_v11, %v43_v10  ;;  %v407_v14 = vld [vmem:[#allocation4 + $0x58] ss:$0 sm:$0xff]  ;;  %v47_v20 = vld [vmem:[#allocation4 + $0x48] sm:$0x3]  ;;  %vm478_vm6 = vmpackc.low %vm223_vm4, %vm547_vm5  ;;  %vm302_vm9 = vcmask 39936   ;;  %vm380_vm10 = vcmask 15360  }
  0x2a   :  { %470 = vmatprep.subr.bf16.mxu0 %v544_v0  ;;  %v477_v21 = vpack.c.bf16 %v47_v20, %v46_v19  ;;  %v409_v22 = vld [vmem:[#allocation4 + $0x60] ss:$0 sm:$0xff]  ;;  %v48_v27 = vld [vmem:[#allocation4 + $0x50] sm:$0x1f]  ;;  %v412_v28 = vld [vmem:[#allocation4 + $0x68] ss:$0 sm:$0xff] }
  0x2b   :  { %475 = vmatpush3.bf16.msra.mxu1 %v474_v12  ;;  %v415_v33 = vld [vmem:[#allocation4 + $0x70] ss:$0 sm:$0xff] }
  0x2c   :  { %450 = vmatprep.subr.mxu1 %v546_v1 }
  0x2d   :  { %472 = vmatpush3.bf16.msra.mxu0 %v471_v7 }
  0x2e   :  { %441 = vmatprep.subr.mxu0 %v546_v1 }
  0x2f   :  { %451 = vmatpush3.msk.msra.mxu1 %vm140_vm2, %v45_v13 }
  0x30   :  { %476 = vmatprep.subr.bf16.mxu1 %v544_v0 }
  0x31   :  { %442 = vmatpush3.msra.mxu0 %v42_v8 }
  0x32   :  { %444 = vmatmul.mubr.msk.f32.vlgmr.msra.gmra.mrb[0].mxu0 %vm57_vm1, %v37_v9  ;;  %462 = vmatprep.subr.mxu0 %v546_v1 }
  0x33   :  { %464 = vmatprep.mubr.msk.f32.mxu0 %vm545_vm0, %v546_v1  ;;  %463 = vmatpush3.msk.msra.mxu0 %vm306_vm8, %v48_v27 }
 0x105   :  { %v127_v15 = vpop.f32.mrb[0].mxu0 }
 0x106   :  { %v128_v16 = vadd.f32 %v407_v14, %v127_v15  ;;  %v445_v17 = vpop.f32.mrb[1].mxu0 }
 0x108   :  { %v131_v18 = vmax.f32 %v128_v16, 0.0 }
 0x10a   :  { %453 = vmatmul.mubr.msk.f32.vlgmr.msra.gmra.mrb[0].mxu1 %vm136_vm3, %v131_v18 }
 0x10b   :  { %459 = vmatprep.mubr.msk.f32.mxu1 %vm545_vm0, %v546_v1  ;;  %479 = vmatpush3.bf16.msk.msra.mxu1 %vm478_vm6, %v477_v21 }
 0x1dd   :  { %v210_v23 = vpop.f32.mrb[0].mxu1 }
 0x1de   :  { %v211_v24 = vadd.f32 %v409_v22, %v210_v23  ;;  %v454_v25 = vpop.f32.mrb[1].mxu1 }
 0x1e0   :  { %v214_v26 = vmax.f32 %v211_v24, 0.0 }
 0x1e2   :  { %460 = vmatmul.mubr.msk.f32.vlgmr.msra.gmra.mrb[2].mxu1 %vm219_vm7, %v214_v26 }
 0x2b5   :  { %v293_v29 = vpop.f32.mrb[2].mxu1 }
 0x2b6   :  { %v294_v30 = vadd.f32 %v412_v28, %v293_v29  ;;  %v461_v31 = vpop.f32.mrb[3].mxu1 }
 0x2b8   :  { %v297_v32 = vmax.f32 %v294_v30, 0.0 }
 0x2ba   :  { %465 = vmatmul.mubr.msk.f32.vlgmr.msra.gmra.mrb[2].mxu0 %vm302_vm9, %v297_v32 }
 0x38d   :  { %v376_v34 = vpop.f32.mrb[2].mxu0 }
 0x38e   :  { %v377_v35 = vadd.f32 %v415_v33, %v376_v34  ;;  %v466_v36 = vpop.f32.mrb[3].mxu0 }
 0x390   :  { %v381_v37 = vsel %vm380_vm10, %v377_v35, -inf }
 0x391   :  { %v382_v38 = vrot.slane %v381_v37, 4 }
 0x393   :  { %v383_v39 = vmax.f32 %v381_v37, %v382_v38 }
 0x395   :  { %v384_v40 = vrot.slane %v383_v39, 2 }
 0x397   :  { %v385_v41 = vmax.f32 %v383_v39, %v384_v40 }
 0x399   :  { %v386_v42 = vrot.slane %v385_v41, 1 }
 0x39b   :  { %v387_v43 = vmax.f32 %v385_v41, %v386_v42 }
 0x39d   :  { %v388_v44 = vsub.f32 %v377_v35, %v387_v43 }
 0x39f   :  { %v389_v45 = vmul.f32 1.442695, %v388_v44 }
 0x3a1   :  { %488 = vpow2.f32 %v389_v45 }
 0x3ab   :  { %v489_v46 = vpop.eup %488 }
 0x3ac   :  { %v391_v47 = vsel %vm380_vm10, %v489_v46, 0.0 }
 0x3ad   :  { %v392_v48 = vrot.slane %v391_v47, 4 }
 0x3af   :  { %v393_v49 = vadd.f32 %v392_v48, %v391_v47 }
 0x3b1   :  { %v394_v50 = vrot.slane %v393_v49, 2 }
 0x3b3   :  { %v395_v51 = vadd.f32 %v394_v50, %v393_v49 }
 0x3b5   :  { %v396_v52 = vrot.slane %v395_v51, 1 }
 0x3b7   :  { %v397_v53 = vadd.f32 %v396_v52, %v395_v51 }
 0x3b9   :  { %490 = vrcp.f32 %v397_v53 }
 0x3c3   :  { %v491_v54 = vpop.eup %490 }
 0x3c4   :  { %v399_v55 = vmul.f32 %v491_v54, %v489_v46 }
 0x3c6   :  { %400 = vst.msk [vmem:[%s606_s2] sm:$0xff] %vm380_vm10, %v399_v55 }
 0x3c7   :  { %405 = vsyncpa [#allocation3], 1 }
 0x3c8   :  { %406 = vsyncpa [#allocation5], 1 }

</bundles_post_ra>
